<compile_context>
chip_gen: v7x
topology: tpu7x:2x2x1
jax: 0.10.0
libtpu: 0.0.40
codegen_flags: <defaults>
</compile_context>

<pallas_src>
import jax
import jax.numpy as jnp
from jax.experimental import pallas as pl
from jax.experimental.pallas import tpu as pltpu

_LANES = 512                              # lane-dense row width (4 x 128 lanes)
_INFLIGHT = 4                             # max in-flight full-size DMA chunks
_DEFAULT_CHUNK_BYTES = 4 * 1024 * 1024    # per-chunk DMA size (no VMEM is used)
_MIN_COPY_BYTES = 64 * 1024               # below this, launch overhead > the copy itself


def _make_hbm_copy_kernel(chunk_rows, n_full, rem_rows):
    """Build a kernel copying an (r, _LANES) HBM slab to another HBM slab via chunked
    async DMA with up to _INFLIGHT outstanding transfers (plus one tail chunk)."""

    def kernel(x_hbm, o_hbm, sems):
        def chunk(start_row, rows, slot):
            return pltpu.make_async_copy(
                x_hbm.at[pl.ds(start_row, rows), :],
                o_hbm.at[pl.ds(start_row, rows), :],
                sems.at[slot],
            )

        # Tail chunk (static size) uses its own semaphore slot; start it first so it
        # overlaps the full-chunk stream.
        if rem_rows > 0:
            chunk(n_full * chunk_rows, rem_rows, _INFLIGHT).start()

        if n_full > 0:
            @pl.loop(0, n_full)
            def _(i):
                slot = i % _INFLIGHT

                @pl.when(i >= _INFLIGHT)
                def _():
                    # Reclaim this slot: wait for the chunk issued _INFLIGHT steps ago.
                    chunk((i - _INFLIGHT) * chunk_rows, chunk_rows, slot).wait()

                chunk(i * chunk_rows, chunk_rows, slot).start()

            # Drain the last (up to _INFLIGHT) outstanding full chunks.
            for j in range(max(0, n_full - _INFLIGHT), n_full):
                chunk(j * chunk_rows, chunk_rows, j % _INFLIGHT).wait()

        if rem_rows > 0:
            chunk(n_full * chunk_rows, rem_rows, _INFLIGHT).wait()

    return kernel


def identity(x, *, force_copy=False, chunk_bytes=_DEFAULT_CHUNK_BYTES):
    """Identity forward pass (out == x, same shape/dtype).

    Default: returns x untouched — zero HBM traffic, the true optimum for Identity.
    force_copy=True: materialises a fresh buffer via a tuned HBM->HBM DMA copy kernel.
    Ragged (n % 512 != 0) or tiny inputs still just return x (no pad/slice fixups).
    """
    if not force_copy:
        return x

    n = int(x.size)
    itemsize = jnp.dtype(x.dtype).itemsize
    if n == 0 or n % _LANES != 0 or n * itemsize < _MIN_COPY_BYTES:
        return x

    r = n // _LANES
    chunk_rows = max(1, int(chunk_bytes) // (_LANES * itemsize))
    chunk_rows = min(chunk_rows, r)
    if chunk_rows >= 8:
        chunk_rows = (chunk_rows // 8) * 8    # keep chunks sublane-aligned
    n_full = r // chunk_rows
    rem_rows = r - n_full * chunk_rows

    x2 = x.reshape(r, _LANES)                 # metadata-only: contiguous flatten
    out2 = pl.pallas_call(
        _make_hbm_copy_kernel(chunk_rows, n_full, rem_rows),
        out_shape=jax.ShapeDtypeStruct((r, _LANES), x.dtype),
        in_specs=[pl.BlockSpec(memory_space=pl.ANY)],
        out_specs=pl.BlockSpec(memory_space=pl.ANY),
        scratch_shapes=[pltpu.SemaphoreType.DMA((_INFLIGHT + 1,))],
    )(x2)
    return out2.reshape(x.shape)


if __name__ == "__main__":
    key = jax.random.PRNGKey(0)

    # Default path: BERT-ish activation (batch=2, seq=8, hidden=32).
    # Identity returns x directly — zero bytes moved, no kernel launch.
    x = jax.random.normal(key, (2, 8, 32), dtype=jnp.float32)
    y = identity(x)
    jax.block_until_ready(y)
    assert y.shape == x.shape and y.dtype == x.dtype
    assert bool(jnp.all(y == x))

    # Forced-copy path: exercises the HBM->HBM DMA kernel with a small 64 KiB chunk so
    # the windowed in-flight loop, the drain, and the tail chunk all run.
    xc = jax.random.normal(key, (2, 196, 512), dtype=jnp.float32)
    yc = identity(xc, force_copy=True, chunk_bytes=64 * 1024)
    jax.block_until_ready(yc)
    assert yc.shape == xc.shape and yc.dtype == xc.dtype
    assert bool(jnp.all(yc == xc))

    # Forced-copy path with the default 4 MiB chunk (single-chunk case), bf16.
    xb = jax.random.normal(key, (2, 128, 512), dtype=jnp.bfloat16)
    yb = identity(xb, force_copy=True)
    jax.block_until_ready(yb)
    assert yb.shape == xb.shape and yb.dtype == xb.dtype
    assert bool(jnp.all(yb == xb))

    print("KERNEL_OK")
</pallas_src>

<mosaic_0001>
module attributes {stable_mosaic.version = 11 : i64} {
  func.func @kernel(%arg0: memref<392x512xf32, #tpu.memory_space<any>>, %arg1: memref<392x512xf32, #tpu.memory_space<any>>, %arg2: memref<5x!tpu.dma_semaphore, #tpu.memory_space<semaphore_mem>>) attributes {dimension_semantics = [], scalar_prefetch = 0 : i64, scratch_operands = 1 : i64, tpu.core_type = #tpu.core_type<tc>} {
    %c4_i32 = arith.constant 4 : i32
    %c384_i32 = arith.constant 384 : i32
    %c0_i32 = arith.constant 0 : i32
    %0 = tpu.memref_slice %arg0[%c384_i32, %c0_i32] : memref<392x512xf32, #tpu.memory_space<any>> -> memref<8x512xf32, #tpu.memory_space<any>>
    %c384_i32_0 = arith.constant 384 : i32
    %c0_i32_1 = arith.constant 0 : i32
    %1 = tpu.memref_slice %arg1[%c384_i32_0, %c0_i32_1] : memref<392x512xf32, #tpu.memory_space<any>> -> memref<8x512xf32, #tpu.memory_space<any>>
    %2 = tpu.memref_slice %arg2[%c4_i32] : memref<5x!tpu.dma_semaphore, #tpu.memory_space<semaphore_mem>> -> memref<1x!tpu.dma_semaphore, #tpu.memory_space<semaphore_mem>>
    %3 = tpu.memref_squeeze %2 : memref<1x!tpu.dma_semaphore, #tpu.memory_space<semaphore_mem>> -> memref<!tpu.dma_semaphore, #tpu.memory_space<semaphore_mem>>
    tpu.enqueue_dma source(%0 : memref<8x512xf32, #tpu.memory_space<any>>) target(%1 : memref<8x512xf32, #tpu.memory_space<any>>) target_semaphore(%3 : memref<!tpu.dma_semaphore, #tpu.memory_space<semaphore_mem>>)
    %c0_i32_2 = arith.constant 0 : i32
    %c12_i32 = arith.constant 12 : i32
    %4 = arith.addi %c0_i32_2, %c12_i32 : i32
    %c1_i32 = arith.constant 1 : i32
    scf.for %arg3 = %c0_i32_2 to %4 step %c1_i32  : i32 {
      %c1_i32_23 = arith.constant 1 : i32
      %25 = arith.muli %arg3, %c1_i32_23 : i32
      %c0_i32_24 = arith.constant 0 : i32
      %26 = arith.addi %c0_i32_24, %25 : i32
      %c4_i32_25 = arith.constant 4 : i32
      %c0_i32_26 = arith.constant 0 : i32
      %27 = arith.cmpi eq, %c4_i32_25, %c0_i32_26 : i32
      %c1_i32_27 = arith.constant 1 : i32
      %28 = arith.select %27, %c1_i32_27, %c4_i32_25 : i32
      %29 = arith.remsi %26, %28 : i32
      %c0_i32_28 = arith.constant 0 : i32
      %30 = arith.cmpi ne, %29, %c0_i32_28 : i32
      %c0_i32_29 = arith.constant 0 : i32
      %31 = arith.cmpi slt, %29, %c0_i32_29 : i32
      %c0_i32_30 = arith.constant 0 : i32
      %32 = arith.cmpi slt, %28, %c0_i32_30 : i32
      %33 = arith.xori %31, %32 : i1
      %34 = arith.andi %33, %30 : i1
      %35 = arith.addi %29, %28 : i32
      %36 = arith.select %34, %35, %29 : i32
      %c4_i32_31 = arith.constant 4 : i32
      %37 = arith.cmpi sge, %26, %c4_i32_31 : i32
      %38 = arith.extui %37 : i1 to i32
      %c0_i32_32 = arith.constant 0 : i32
      %39 = arith.cmpi ne, %38, %c0_i32_32 : i32
      scf.if %39 {
        %c4_i32_35 = arith.constant 4 : i32
        %45 = arith.subi %26, %c4_i32_35 : i32
        %c32_i32_36 = arith.constant 32 : i32
        %46 = arith.muli %45, %c32_i32_36 : i32
        %c0_i32_37 = arith.constant 0 : i32
        %47 = tpu.memref_slice %arg0[%46, %c0_i32_37] : memref<392x512xf32, #tpu.memory_space<any>> -> memref<32x512xf32, #tpu.memory_space<any>>
        %c0_i32_38 = arith.constant 0 : i32
        %48 = tpu.memref_slice %arg1[%46, %c0_i32_38] : memref<392x512xf32, #tpu.memory_space<any>> -> memref<32x512xf32, #tpu.memory_space<any>>
        %49 = tpu.memref_slice %arg2[%36] : memref<5x!tpu.dma_semaphore, #tpu.memory_space<semaphore_mem>> -> memref<1x!tpu.dma_semaphore, #tpu.memory_space<semaphore_mem>>
        %50 = tpu.memref_squeeze %49 : memref<1x!tpu.dma_semaphore, #tpu.memory_space<semaphore_mem>> -> memref<!tpu.dma_semaphore, #tpu.memory_space<semaphore_mem>>
        tpu.wait_dma2 semaphore(%50 : memref<!tpu.dma_semaphore, #tpu.memory_space<semaphore_mem>>) src(%47 : memref<32x512xf32, #tpu.memory_space<any>>) dst(%48 : memref<32x512xf32, #tpu.memory_space<any>>)
      } else {
      }
      %c32_i32 = arith.constant 32 : i32
      %40 = arith.muli %26, %c32_i32 : i32
      %c0_i32_33 = arith.constant 0 : i32
      %41 = tpu.memref_slice %arg0[%40, %c0_i32_33] : memref<392x512xf32, #tpu.memory_space<any>> -> memref<32x512xf32, #tpu.memory_space<any>>
      %c0_i32_34 = arith.constant 0 : i32
      %42 = tpu.memref_slice %arg1[%40, %c0_i32_34] : memref<392x512xf32, #tpu.memory_space<any>> -> memref<32x512xf32, #tpu.memory_space<any>>
      %43 = tpu.memref_slice %arg2[%36] : memref<5x!tpu.dma_semaphore, #tpu.memory_space<semaphore_mem>> -> memref<1x!tpu.dma_semaphore, #tpu.memory_space<semaphore_mem>>
      %44 = tpu.memref_squeeze %43 : memref<1x!tpu.dma_semaphore, #tpu.memory_space<semaphore_mem>> -> memref<!tpu.dma_semaphore, #tpu.memory_space<semaphore_mem>>
      tpu.enqueue_dma source(%41 : memref<32x512xf32, #tpu.memory_space<any>>) target(%42 : memref<32x512xf32, #tpu.memory_space<any>>) target_semaphore(%44 : memref<!tpu.dma_semaphore, #tpu.memory_space<semaphore_mem>>)
    }
    %c12_i32_3 = arith.constant 12 : i32
    %c0_i32_4 = arith.constant 0 : i32
    %c256_i32 = arith.constant 256 : i32
    %c0_i32_5 = arith.constant 0 : i32
    %5 = tpu.memref_slice %arg0[%c256_i32, %c0_i32_5] : memref<392x512xf32, #tpu.memory_space<any>> -> memref<32x512xf32, #tpu.memory_space<any>>
    %c256_i32_6 = arith.constant 256 : i32
    %c0_i32_7 = arith.constant 0 : i32
    %6 = tpu.memref_slice %arg1[%c256_i32_6, %c0_i32_7] : memref<392x512xf32, #tpu.memory_space<any>> -> memref<32x512xf32, #tpu.memory_space<any>>
    %7 = tpu.memref_slice %arg2[%c0_i32_4] : memref<5x!tpu.dma_semaphore, #tpu.memory_space<semaphore_mem>> -> memref<1x!tpu.dma_semaphore, #tpu.memory_space<semaphore_mem>>
    %8 = tpu.memref_squeeze %7 : memref<1x!tpu.dma_semaphore, #tpu.memory_space<semaphore_mem>> -> memref<!tpu.dma_semaphore, #tpu.memory_space<semaphore_mem>>
    tpu.wait_dma2 semaphore(%8 : memref<!tpu.dma_semaphore, #tpu.memory_space<semaphore_mem>>) src(%5 : memref<32x512xf32, #tpu.memory_space<any>>) dst(%6 : memref<32x512xf32, #tpu.memory_space<any>>)
    %c1_i32_8 = arith.constant 1 : i32
    %c288_i32 = arith.constant 288 : i32
    %c0_i32_9 = arith.constant 0 : i32
    %9 = tpu.memref_slice %arg0[%c288_i32, %c0_i32_9] : memref<392x512xf32, #tpu.memory_space<any>> -> memref<32x512xf32, #tpu.memory_space<any>>
    %c288_i32_10 = arith.constant 288 : i32
    %c0_i32_11 = arith.constant 0 : i32
    %10 = tpu.memref_slice %arg1[%c288_i32_10, %c0_i32_11] : memref<392x512xf32, #tpu.memory_space<any>> -> memref<32x512xf32, #tpu.memory_space<any>>
    %11 = tpu.memref_slice %arg2[%c1_i32_8] : memref<5x!tpu.dma_semaphore, #tpu.memory_space<semaphore_mem>> -> memref<1x!tpu.dma_semaphore, #tpu.memory_space<semaphore_mem>>
    %12 = tpu.memref_squeeze %11 : memref<1x!tpu.dma_semaphore, #tpu.memory_space<semaphore_mem>> -> memref<!tpu.dma_semaphore, #tpu.memory_space<semaphore_mem>>
    tpu.wait_dma2 semaphore(%12 : memref<!tpu.dma_semaphore, #tpu.memory_space<semaphore_mem>>) src(%9 : memref<32x512xf32, #tpu.memory_space<any>>) dst(%10 : memref<32x512xf32, #tpu.memory_space<any>>)
    %c2_i32 = arith.constant 2 : i32
    %c320_i32 = arith.constant 320 : i32
    %c0_i32_12 = arith.constant 0 : i32
    %13 = tpu.memref_slice %arg0[%c320_i32, %c0_i32_12] : memref<392x512xf32, #tpu.memory_space<any>> -> memref<32x512xf32, #tpu.memory_space<any>>
    %c320_i32_13 = arith.constant 320 : i32
    %c0_i32_14 = arith.constant 0 : i32
    %14 = tpu.memref_slice %arg1[%c320_i32_13, %c0_i32_14] : memref<392x512xf32, #tpu.memory_space<any>> -> memref<32x512xf32, #tpu.memory_space<any>>
    %15 = tpu.memref_slice %arg2[%c2_i32] : memref<5x!tpu.dma_semaphore, #tpu.memory_space<semaphore_mem>> -> memref<1x!tpu.dma_semaphore, #tpu.memory_space<semaphore_mem>>
    %16 = tpu.memref_squeeze %15 : memref<1x!tpu.dma_semaphore, #tpu.memory_space<semaphore_mem>> -> memref<!tpu.dma_semaphore, #tpu.memory_space<semaphore_mem>>
    tpu.wait_dma2 semaphore(%16 : memref<!tpu.dma_semaphore, #tpu.memory_space<semaphore_mem>>) src(%13 : memref<32x512xf32, #tpu.memory_space<any>>) dst(%14 : memref<32x512xf32, #tpu.memory_space<any>>)
    %c3_i32 = arith.constant 3 : i32
    %c352_i32 = arith.constant 352 : i32
    %c0_i32_15 = arith.constant 0 : i32
    %17 = tpu.memref_slice %arg0[%c352_i32, %c0_i32_15] : memref<392x512xf32, #tpu.memory_space<any>> -> memref<32x512xf32, #tpu.memory_space<any>>
    %c352_i32_16 = arith.constant 352 : i32
    %c0_i32_17 = arith.constant 0 : i32
    %18 = tpu.memref_slice %arg1[%c352_i32_16, %c0_i32_17] : memref<392x512xf32, #tpu.memory_space<any>> -> memref<32x512xf32, #tpu.memory_space<any>>
    %19 = tpu.memref_slice %arg2[%c3_i32] : memref<5x!tpu.dma_semaphore, #tpu.memory_space<semaphore_mem>> -> memref<1x!tpu.dma_semaphore, #tpu.memory_space<semaphore_mem>>
    %20 = tpu.memref_squeeze %19 : memref<1x!tpu.dma_semaphore, #tpu.memory_space<semaphore_mem>> -> memref<!tpu.dma_semaphore, #tpu.memory_space<semaphore_mem>>
    tpu.wait_dma2 semaphore(%20 : memref<!tpu.dma_semaphore, #tpu.memory_space<semaphore_mem>>) src(%17 : memref<32x512xf32, #tpu.memory_space<any>>) dst(%18 : memref<32x512xf32, #tpu.memory_space<any>>)
    %c4_i32_18 = arith.constant 4 : i32
    %c384_i32_19 = arith.constant 384 : i32
    %c0_i32_20 = arith.constant 0 : i32
    %21 = tpu.memref_slice %arg0[%c384_i32_19, %c0_i32_20] : memref<392x512xf32, #tpu.memory_space<any>> -> memref<8x512xf32, #tpu.memory_space<any>>
    %c384_i32_21 = arith.constant 384 : i32
    %c0_i32_22 = arith.constant 0 : i32
    %22 = tpu.memref_slice %arg1[%c384_i32_21, %c0_i32_22] : memref<392x512xf32, #tpu.memory_space<any>> -> memref<8x512xf32, #tpu.memory_space<any>>
    %23 = tpu.memref_slice %arg2[%c4_i32_18] : memref<5x!tpu.dma_semaphore, #tpu.memory_space<semaphore_mem>> -> memref<1x!tpu.dma_semaphore, #tpu.memory_space<semaphore_mem>>
    %24 = tpu.memref_squeeze %23 : memref<1x!tpu.dma_semaphore, #tpu.memory_space<semaphore_mem>> -> memref<!tpu.dma_semaphore, #tpu.memory_space<semaphore_mem>>
    tpu.wait_dma2 semaphore(%24 : memref<!tpu.dma_semaphore, #tpu.memory_space<semaphore_mem>>) src(%21 : memref<8x512xf32, #tpu.memory_space<any>>) dst(%22 : memref<8x512xf32, #tpu.memory_space<any>>)
    return
  }
}

</mosaic_0001>

<bundles_post_ra>
// kernel: tpu_custom_call.1
= control target key start
LH: loop header
LB: loop body
LE: loop exit
PB: predicated region body
PF: predicated region fallthrough
CT: control target
= control target key end

     0   :  { %s186_s12 = smov [#allocation2 + $0x4]   ;;  %s187_s13 = smov [#allocation3]   ;;  %s213_s0 = inlined_call_operand.hbm [shape: f32[392,512], index: 0, kind: input, shape index: {}]   ;;  %s214_s1 = inlined_call_operand.hbm [shape: f32[392,512], index: 1, kind: output, shape index: {}]  }
   0x1   :  { %s6_s8 = scalar_lea.hbm %s213_s0, 24576  ;;  %s7_s11 = scalar_lea.hbm %s214_s1, 24576 }
   0x2   :  { %s188_s14 = smov 0   ;;  %s182_s15 = smov 0  }
   0x3   :  { %21 = dma.general %s6_s8, 512, %s7_s11, %s186_s12, %s187_s13, [#allocation4], %s188_s14, 0  }
   0x4 LB: > { %p28_p0 = scmp.lt.s32.totalorder %s184_s15, 0  ;;  %s29_s16 = ssub.s32 0, %s184_s15  ;;  %s184_s15 = sphi %s182_s15, %s27_s15  }
   0x5   : > { %s133_s17 = smin.u32 %s184_s15, %s29_s16  ;;  %p150_p1 = scmp.ge.s32.totalorder %s184_s15, 4 }
   0x6   : > { %s31_s18 = sand.u32 3, %s133_s17  }
   0x7   : > { %s32_s19 = ssub.s32 0, %s31_s18 }
   0x8   : > { %s216_s19 = smov (!%p28_p0, %s32_s19), %s31_s18 }
   0x9   : > { %p135_p2 = scmp.lt.s32.totalorder %s216_s19, 0  ;;  %s38_s20 = sadd.s32 4, %s216_s19 }
   0xb   : > { %s218_s20 = smov (!%p135_p2, %s38_s20), %s216_s19 }
   0xc   : > { %s44_s21 = scalar_lea.sflag [#allocation2], %s218_s20 }
   0xd   : > { %169 = dma.done.wait (%p150_p1), %s44_s21, 2048 }
   0xe   : > { %171 = vsyncadd (%p150_p1), %s44_s21, 4294965248  ;;  %s137_s22 = sshll.u32 %s184_s15, 5  ;;  %s189_s2 = smov [#allocation5]  }
   0xf   : > { %s50_s23 = sshra.s32 %s137_s22, 3  ;;  %s190_s3 = smov 0  }
  0x10   : > { %s146_s24 = sshll.u32 %s50_s23, 9  ;;  %s27_s15 = sadd.s32 1, %s184_s15  }
  0x11   : > { %s54_s27 = scalar_lea.hbm %s213_s0, %s146_s24  ;;  %s56_s30 = scalar_lea.hbm %s214_s1, %s146_s24 }
  0x12   : > { %70 = dma.general %s54_s27, 2048, %s56_s30, %s44_s21, %s189_s2, [#allocation6], %s190_s3, 0  }
  0x13   : > { %p24_p3 = scmp.ge.s32.totalorder %s27_s15, 12  }
  0x15   :  { %26 = sbr.rel (!%p24_p3) target bundleno = 4 (0x4), region = 37 }
  0x1c   :  { %172 = dma.done.wait [#allocation2], 2048 }
  0x1d   :  { %173 = vsyncadd [#allocation2], 4294965248 }
  0x1e   :  { %174 = dma.done.wait [#allocation2 + $0x1], 2048 }
  0x1f   :  { %175 = vsyncadd [#allocation2 + $0x1], 4294965248 }
  0x20   :  { %176 = dma.done.wait [#allocation2 + $0x2], 2048 }
  0x21   :  { %177 = vsyncadd [#allocation2 + $0x2], 4294965248 }
  0x22   :  { %178 = dma.done.wait [#allocation2 + $0x3], 2048 }
  0x23   :  { %179 = vsyncadd [#allocation2 + $0x3], 4294965248 }
  0x24   :  { %180 = dma.done.wait [#allocation2 + $0x4], 512 }
  0x25   :  { %181 = vsyncadd [#allocation2 + $0x4], 4294966784 }
  0x26   :  { %88 = vsyncmov [#allocation2] }
  0x29   :  { %s89_s4 = vpop.sfrf %88 }
  0x2a   :  { %p141_p4 = scmp.ne.s32.totalorder %s89_s4, 0 }
  0x2c   :  { %93 = shalt.err (%p141_p4)  }
  0x2d   :  { %95 = vsyncmov [#allocation2 + $0x1] }
  0x30   :  { %s96_s5 = vpop.sfrf %95 }
  0x31   :  { %p142_p5 = scmp.ne.s32.totalorder %s96_s5, 0 }
  0x33   :  { %100 = shalt.err (%p142_p5)  }
  0x34   :  { %102 = vsyncmov [#allocation2 + $0x2] }
  0x37   :  { %s103_s6 = vpop.sfrf %102 }
  0x38   :  { %p143_p6 = scmp.ne.s32.totalorder %s103_s6, 0 }
  0x3a   :  { %107 = shalt.err (%p143_p6)  }
  0x3b   :  { %109 = vsyncmov [#allocation2 + $0x3] }
  0x3e   :  { %s110_s0 = vpop.sfrf %109 }
  0x3f   :  { %p144_p7 = scmp.ne.s32.totalorder %s110_s0, 0 }
  0x41   :  { %114 = shalt.err (%p144_p7)  }
  0x42   :  { %116 = vsyncmov [#allocation2 + $0x4] }
  0x45   :  { %s117_s1 = vpop.sfrf %116 }
  0x46   :  { %p145_p8 = scmp.ne.s32.totalorder %s117_s1, 0 }
  0x48   :  { %121 = shalt.err (%p145_p8)  }

</bundles_post_ra>
